<compile_context>
chip_gen: v5e
topology: v5e:2x2
jax: 0.10.0
libtpu: 0.0.40
codegen_flags: <defaults>
</compile_context>

<pallas_src>
import jax
import jax.numpy as jnp
from jax import lax
from jax.experimental import pallas as pl
from jax.experimental.pallas import tpu as pltpu
import numpy as np


# ----------------------------------------------------------------------------
# One-time parameter repacking (module "init" time, NOT per forward call).
# ----------------------------------------------------------------------------
def prepare_self_attention_params(params, num_heads):
    w_qkv = jnp.asarray(params["w_qkv"], jnp.float32)    # (3C, C)  torch layout
    b_qkv = jnp.asarray(params["b_qkv"], jnp.float32)    # (3C,)
    w_proj = jnp.asarray(params["w_proj"], jnp.float32)  # (C, C)
    b_proj = jnp.asarray(params["b_proj"], jnp.float32)  # (C,)

    C = w_proj.shape[0]
    H = num_heads
    hd = C // H
    scale = float(hd) ** (-0.5)

    # qkv output channel = three*C + h*hd + d  (matches torch reshape(B,N,3,H,hd))
    wt = jnp.transpose(w_qkv).reshape(C, 3, H, hd)        # (Cin, 3, H, hd)
    bt = b_qkv.reshape(3, H, hd)

    # (H, Cin, hd); scale folded into the q projection since
    # softmax(q@k^T * s) == softmax((q*s)@k^T)  -> no in-kernel `* scale`.
    wq = jnp.transpose(wt[:, 0], (1, 0, 2)) * scale
    wk = jnp.transpose(wt[:, 1], (1, 0, 2))
    wv = jnp.transpose(wt[:, 2], (1, 0, 2))
    bq = (bt[0] * scale).reshape(H, 1, hd)
    bk = bt[1].reshape(H, 1, hd)
    bv = bt[2].reshape(H, 1, hd)

    wp = jnp.transpose(w_proj).reshape(H, hd, C)          # per-head proj rows
    bp = b_proj.reshape(1, C)
    return dict(wq=wq, wk=wk, wv=wv, bq=bq, bk=bk, bv=bv, wp=wp, bp=bp)


# ----------------------------------------------------------------------------
# Fused kernel: one grid step = one (batch, head) pair.
#   q/k/v projection -> scaled-dot-product softmax -> ctx -> this head's proj
#   contribution accumulated into the resident (1, N, C) output block.
# ----------------------------------------------------------------------------
def fused_self_attention_kernel(x_ref, wq_ref, wk_ref, wv_ref,
                                bq_ref, bk_ref, bv_ref, wp_ref, bp_ref,
                                out_ref, attn_ref):
    h = pl.program_id(1)
    x = x_ref[0]                                                      # (N, C)

    q = jnp.dot(x, wq_ref[0], preferred_element_type=jnp.float32) + bq_ref[0]
    k = jnp.dot(x, wk_ref[0], preferred_element_type=jnp.float32) + bk_ref[0]
    v = jnp.dot(x, wv_ref[0], preferred_element_type=jnp.float32) + bv_ref[0]

    # contract on head_dim of BOTH operands -> no explicit k.T transpose
    s = lax.dot_general(q, k, dimension_numbers=(((1,), (1,)), ((), ())),
                        preferred_element_type=jnp.float32)          # (N, N)

    m = jnp.max(s, axis=-1, keepdims=True)
    p = jnp.exp(s - m)
    # exact reciprocal keeps the 1e-5 reference tolerance; flip to approx=True
    # (EUP vrcp, off the VPU critical path) if ~1e-4 relative error is fine.
    p = p * pl.reciprocal(jnp.sum(p, axis=-1, keepdims=True), approx=False)

    attn_ref[0, 0] = p.astype(attn_ref.dtype)                        # one (N,N) store

    ctx = jnp.dot(p, v, preferred_element_type=jnp.float32)          # (N, hd)
    part = jnp.dot(ctx, wp_ref[0], preferred_element_type=jnp.float32)  # (N, C)

    @pl.when(h == 0)
    def _():
        out_ref[0] = (part + bp_ref[...]).astype(out_ref.dtype)

    @pl.when(h != 0)
    def _():
        out_ref[0] = out_ref[0] + part.astype(out_ref.dtype)


# ----------------------------------------------------------------------------
# SelfAttention forward (single fused pallas_call).
# ----------------------------------------------------------------------------
def self_attention_forward(x, prepared, num_heads):
    B, N, C = x.shape
    H = num_heads
    hd = C // H

    # TODO(synk): for realistic N, add q-tile / kv-tile grid axes with an online (flash-style) softmax so the (N,N) block never exceeds the scoped VMEM limit.
    # TODO(synk): single-buffer the fully grid-invariant bp block via pipeline_mode=pl.Buffered(1) once VMEM pressure matters at larger C.
    out, attn = pl.pallas_call(
        fused_self_attention_kernel,
        out_shape=(
            jax.ShapeDtypeStruct((B, N, C), jnp.float32),
            jax.ShapeDtypeStruct((B, H, N, N), jnp.float32),
        ),
        grid_spec=pltpu.PrefetchScalarGridSpec(
            num_scalar_prefetch=0,
            grid=(B, H),
            in_specs=[
                pl.BlockSpec((1, N, C), lambda b, h: (b, 0, 0)),        # x
                pl.BlockSpec((1, C, hd), lambda b, h: (h, 0, 0)),       # wq
                pl.BlockSpec((1, C, hd), lambda b, h: (h, 0, 0)),       # wk
                pl.BlockSpec((1, C, hd), lambda b, h: (h, 0, 0)),       # wv
                pl.BlockSpec((1, 1, hd), lambda b, h: (h, 0, 0)),       # bq
                pl.BlockSpec((1, 1, hd), lambda b, h: (h, 0, 0)),       # bk
                pl.BlockSpec((1, 1, hd), lambda b, h: (h, 0, 0)),       # bv
                pl.BlockSpec((1, hd, C), lambda b, h: (h, 0, 0)),       # wp
                pl.BlockSpec((1, C), lambda b, h: (0, 0)),              # bp
            ],
            out_specs=(
                pl.BlockSpec((1, N, C), lambda b, h: (b, 0, 0)),        # out (resident across h)
                pl.BlockSpec((1, 1, N, N), lambda b, h: (b, h, 0, 0)),  # attn
            ),
        ),
        compiler_params=pltpu.CompilerParams(
            dimension_semantics=("parallel", "arbitrary"),
        ),
    )(x, prepared["wq"], prepared["wk"], prepared["wv"],
      prepared["bq"], prepared["bk"], prepared["bv"],
      prepared["wp"], prepared["bp"])
    return out, attn


# ----------------------------------------------------------------------------
# Pure-JAX reference (for correctness check) — uses the raw PyTorch-layout params.
# ----------------------------------------------------------------------------
def self_attention_reference(x, params, num_heads):
    B, N, C = x.shape
    head_dim = C // num_heads
    scale = float(head_dim) ** (-0.5)
    qkv = x @ params["w_qkv"].T + params["b_qkv"]
    qkv = qkv.reshape(B, N, 3, num_heads, head_dim).transpose(2, 0, 3, 1, 4)
    q, k, v = qkv[0], qkv[1], qkv[2]
    s = jnp.einsum("bhqd,bhkd->bhqk", q, k) * scale
    attn = jax.nn.softmax(s, axis=-1)
    ctx = jnp.einsum("bhqk,bhkd->bhqd", attn, v)
    ctx = ctx.transpose(0, 2, 1, 3).reshape(B, N, C)
    out = ctx @ params["w_proj"].T + params["b_proj"]
    return out, attn


if __name__ == "__main__":
    # Small shapes implied by the forward:  x: (B, N, C)
    B, N, C = 2, 8, 32
    num_heads = 4

    key = jax.random.PRNGKey(0)
    k_x, k_wq, k_bq, k_wp, k_bp = jax.random.split(key, 5)

    # Deterministic parameter init (PyTorch Linear-style uniform bounds).
    bound = 1.0 / np.sqrt(C)
    params = {
        "w_qkv": jax.random.uniform(k_wq, (3 * C, C), jnp.float32, -bound, bound),
        "b_qkv": jax.random.uniform(k_bq, (3 * C,), jnp.float32, -bound, bound),
        "w_proj": jax.random.uniform(k_wp, (C, C), jnp.float32, -bound, bound),
        "b_proj": jax.random.uniform(k_bp, (C,), jnp.float32, -bound, bound),
    }

    x = jax.random.normal(k_x, (B, N, C), jnp.float32)

    # One-time parameter prep (transpose / scale-fold / per-head split).
    prepared = prepare_self_attention_params(params, num_heads)

    out, attn = self_attention_forward(x, prepared, num_heads)
    out = jax.block_until_ready(out)
    attn = jax.block_until_ready(attn)

    out_ref, attn_ref = self_attention_reference(x, params, num_heads)
    np.testing.assert_allclose(np.asarray(out), np.asarray(out_ref), rtol=1e-5, atol=1e-5)
    np.testing.assert_allclose(np.asarray(attn), np.asarray(attn_ref), rtol=1e-5, atol=1e-5)

    print("KERNEL_OK")
</pallas_src>

<mosaic_0001>
module attributes {stable_mosaic.version = 11 : i64} {
  func.func @fused_self_attention_kernel(%arg0: i32, %arg1: i32, %arg2: memref<1x8x32xf32, #tpu.memory_space<vmem>>, %arg3: memref<1x32x8xf32, #tpu.memory_space<vmem>>, %arg4: memref<1x32x8xf32, #tpu.memory_space<vmem>>, %arg5: memref<1x32x8xf32, #tpu.memory_space<vmem>>, %arg6: memref<1x1x8xf32, #tpu.memory_space<vmem>>, %arg7: memref<1x1x8xf32, #tpu.memory_space<vmem>>, %arg8: memref<1x1x8xf32, #tpu.memory_space<vmem>>, %arg9: memref<1x8x32xf32, #tpu.memory_space<vmem>>, %arg10: memref<1x32xf32, #tpu.memory_space<vmem>>, %arg11: memref<1x8x32xf32, #tpu.memory_space<vmem>>, %arg12: memref<1x1x8x8xf32, #tpu.memory_space<vmem>>) attributes {dimension_semantics = [#tpu.dimension_semantics<parallel>, #tpu.dimension_semantics<arbitrary>], iteration_bounds = array<i64: 2, 4>, scalar_prefetch = 0 : i64, scratch_operands = 0 : i64, tpu.core_type = #tpu.core_type<tc>, window_params = [{transform_indices = @transform_0, window_bounds = array<i64: 1, 8, 32>}, {transform_indices = @transform_1, window_bounds = array<i64: 1, 32, 8>}, {transform_indices = @transform_2, window_bounds = array<i64: 1, 32, 8>}, {transform_indices = @transform_3, window_bounds = array<i64: 1, 32, 8>}, {transform_indices = @transform_4, window_bounds = array<i64: 1, 1, 8>}, {transform_indices = @transform_5, window_bounds = array<i64: 1, 1, 8>}, {transform_indices = @transform_6, window_bounds = array<i64: 1, 1, 8>}, {transform_indices = @transform_7, window_bounds = array<i64: 1, 8, 32>}, {pipeline_mode = #tpu.pipeline_mode<synchronous>, transform_indices = @transform_8, window_bounds = array<i64: 1, 32>}, {transform_indices = @transform_9, window_bounds = array<i64: 1, 8, 32>}, {transform_indices = @transform_10, window_bounds = array<i64: 1, 1, 8, 8>}]} {
    %c0 = arith.constant 0 : index
    %c0_0 = arith.constant 0 : index
    %c0_1 = arith.constant 0 : index
    %0 = vector.load %arg2[%c0, %c0_0, %c0_1] : memref<1x8x32xf32, #tpu.memory_space<vmem>>, vector<1x8x32xf32>
    %1 = vector.shape_cast %0 : vector<1x8x32xf32> to vector<8x32xf32>
    %c0_2 = arith.constant 0 : index
    %c0_3 = arith.constant 0 : index
    %c0_4 = arith.constant 0 : index
    %2 = vector.load %arg3[%c0_2, %c0_3, %c0_4] : memref<1x32x8xf32, #tpu.memory_space<vmem>>, vector<1x32x8xf32>
    %3 = vector.shape_cast %2 : vector<1x32x8xf32> to vector<32x8xf32>
    %cst = arith.constant dense<0.000000e+00> : vector<8x8xf32>
    %4 = tpu.matmul %1, %3, %cst {dimension_numbers = #tpu.dot_dimension_numbers<[1], [0], [0], [1], [0, 0, 1, 1], [], []>} : vector<8x32xf32>, vector<32x8xf32>, vector<8x8xf32> -> vector<8x8xf32>
    %c0_5 = arith.constant 0 : index
    %c0_6 = arith.constant 0 : index
    %c0_7 = arith.constant 0 : index
    %5 = vector.load %arg6[%c0_5, %c0_6, %c0_7] : memref<1x1x8xf32, #tpu.memory_space<vmem>>, vector<1x1x8xf32>
    %6 = vector.shape_cast %5 : vector<1x1x8xf32> to vector<1x8xf32>
    %7 = vector.broadcast %6 : vector<1x8xf32> to vector<8x8xf32>
    %8 = arith.addf %4, %7 : vector<8x8xf32>
    %c0_8 = arith.constant 0 : index
    %c0_9 = arith.constant 0 : index
    %c0_10 = arith.constant 0 : index
    %9 = vector.load %arg4[%c0_8, %c0_9, %c0_10] : memref<1x32x8xf32, #tpu.memory_space<vmem>>, vector<1x32x8xf32>
    %10 = vector.shape_cast %9 : vector<1x32x8xf32> to vector<32x8xf32>
    %cst_11 = arith.constant dense<0.000000e+00> : vector<8x8xf32>
    %11 = tpu.matmul %1, %10, %cst_11 {dimension_numbers = #tpu.dot_dimension_numbers<[1], [0], [0], [1], [0, 0, 1, 1], [], []>} : vector<8x32xf32>, vector<32x8xf32>, vector<8x8xf32> -> vector<8x8xf32>
    %c0_12 = arith.constant 0 : index
    %c0_13 = arith.constant 0 : index
    %c0_14 = arith.constant 0 : index
    %12 = vector.load %arg7[%c0_12, %c0_13, %c0_14] : memref<1x1x8xf32, #tpu.memory_space<vmem>>, vector<1x1x8xf32>
    %13 = vector.shape_cast %12 : vector<1x1x8xf32> to vector<1x8xf32>
    %14 = vector.broadcast %13 : vector<1x8xf32> to vector<8x8xf32>
    %15 = arith.addf %11, %14 : vector<8x8xf32>
    %c0_15 = arith.constant 0 : index
    %c0_16 = arith.constant 0 : index
    %c0_17 = arith.constant 0 : index
    %16 = vector.load %arg5[%c0_15, %c0_16, %c0_17] : memref<1x32x8xf32, #tpu.memory_space<vmem>>, vector<1x32x8xf32>
    %17 = vector.shape_cast %16 : vector<1x32x8xf32> to vector<32x8xf32>
    %cst_18 = arith.constant dense<0.000000e+00> : vector<8x8xf32>
    %18 = tpu.matmul %1, %17, %cst_18 {dimension_numbers = #tpu.dot_dimension_numbers<[1], [0], [0], [1], [0, 0, 1, 1], [], []>} : vector<8x32xf32>, vector<32x8xf32>, vector<8x8xf32> -> vector<8x8xf32>
    %c0_19 = arith.constant 0 : index
    %c0_20 = arith.constant 0 : index
    %c0_21 = arith.constant 0 : index
    %19 = vector.load %arg8[%c0_19, %c0_20, %c0_21] : memref<1x1x8xf32, #tpu.memory_space<vmem>>, vector<1x1x8xf32>
    %20 = vector.shape_cast %19 : vector<1x1x8xf32> to vector<1x8xf32>
    %21 = vector.broadcast %20 : vector<1x8xf32> to vector<8x8xf32>
    %22 = arith.addf %18, %21 : vector<8x8xf32>
    %cst_22 = arith.constant dense<0.000000e+00> : vector<8x8xf32>
    %23 = tpu.matmul %8, %15, %cst_22 {dimension_numbers = #tpu.dot_dimension_numbers<[1], [1], [0], [0], [0, 0, 1, 0], [], []>} : vector<8x8xf32>, vector<8x8xf32>, vector<8x8xf32> -> vector<8x8xf32>
    %cst_23 = arith.constant dense<0xFF800000> : vector<8xf32>
    %24 = vector.multi_reduction <maximumf>, %23, %cst_23 [1] : vector<8x8xf32> to vector<8xf32>
    %25 = vector.shape_cast %24 : vector<8xf32> to vector<8x1xf32>
    %26 = vector.broadcast %25 : vector<8x1xf32> to vector<8x8xf32>
    %27 = arith.subf %23, %26 : vector<8x8xf32>
    %28 = math.exp %27 : vector<8x8xf32>
    %cst_24 = arith.constant dense<0.000000e+00> : vector<8xf32>
    %29 = vector.multi_reduction <add>, %28, %cst_24 [1] : vector<8x8xf32> to vector<8xf32>
    %30 = vector.shape_cast %29 : vector<8xf32> to vector<8x1xf32>
    %31 = tpu.reciprocal %30 : vector<8x1xf32> -> vector<8x1xf32>
    %32 = vector.broadcast %31 : vector<8x1xf32> to vector<8x8xf32>
    %33 = arith.mulf %28, %32 : vector<8x8xf32>
    %c0_25 = arith.constant 0 : index
    %c0_26 = arith.constant 0 : index
    %c0_27 = arith.constant 0 : index
    %c0_28 = arith.constant 0 : index
    %34 = vector.load %arg12[%c0_25, %c0_26, %c0_27, %c0_28] : memref<1x1x8x8xf32, #tpu.memory_space<vmem>>, vector<1x1x8x8xf32>
    %35 = vector.shape_cast %34 : vector<1x1x8x8xf32> to vector<8x8xf32>
    %36 = vector.shape_cast %33 : vector<8x8xf32> to vector<1x1x8x8xf32>
    tpu.vector_store %arg12[%c0_25, %c0_26, %c0_27, %c0_28], %36 {strides = array<i32>} : memref<1x1x8x8xf32, #tpu.memory_space<vmem>>, vector<1x1x8x8xf32>,
    %cst_29 = arith.constant dense<0.000000e+00> : vector<8x8xf32>
    %37 = tpu.matmul %33, %22, %cst_29 {dimension_numbers = #tpu.dot_dimension_numbers<[1], [0], [0], [1], [0, 0, 1, 1], [], []>} : vector<8x8xf32>, vector<8x8xf32>, vector<8x8xf32> -> vector<8x8xf32>
    %c0_30 = arith.constant 0 : index
    %c0_31 = arith.constant 0 : index
    %c0_32 = arith.constant 0 : index
    %38 = vector.load %arg9[%c0_30, %c0_31, %c0_32] : memref<1x8x32xf32, #tpu.memory_space<vmem>>, vector<1x8x32xf32>
    %39 = vector.shape_cast %38 : vector<1x8x32xf32> to vector<8x32xf32>
    %cst_33 = arith.constant dense<0.000000e+00> : vector<8x32xf32>
    %40 = tpu.matmul %37, %39, %cst_33 {dimension_numbers = #tpu.dot_dimension_numbers<[1], [0], [0], [1], [0, 0, 1, 1], [], []>} : vector<8x8xf32>, vector<8x32xf32>, vector<8x32xf32> -> vector<8x32xf32>
    %c0_i32 = arith.constant 0 : i32
    %41 = arith.cmpi eq, %arg1, %c0_i32 : i32
    %42 = arith.extui %41 : i1 to i32
    %c0_i32_34 = arith.constant 0 : i32
    %43 = arith.cmpi ne, %42, %c0_i32_34 : i32
    scf.if %43 {
      %c0_37 = arith.constant 0 : index
      %c0_38 = arith.constant 0 : index
      %47 = vector.load %arg10[%c0_37, %c0_38] : memref<1x32xf32, #tpu.memory_space<vmem>>, vector<1x32xf32>
      %48 = vector.broadcast %47 : vector<1x32xf32> to vector<8x32xf32>
      %49 = arith.addf %40, %48 : vector<8x32xf32>
      %c0_39 = arith.constant 0 : index
      %c0_40 = arith.constant 0 : index
      %c0_41 = arith.constant 0 : index
      %50 = vector.load %arg11[%c0_39, %c0_40, %c0_41] : memref<1x8x32xf32, #tpu.memory_space<vmem>>, vector<1x8x32xf32>
      %51 = vector.shape_cast %50 : vector<1x8x32xf32> to vector<8x32xf32>
      %52 = vector.shape_cast %49 : vector<8x32xf32> to vector<1x8x32xf32>
      tpu.vector_store %arg11[%c0_39, %c0_40, %c0_41], %52 {strides = array<i32>} : memref<1x8x32xf32, #tpu.memory_space<vmem>>, vector<1x8x32xf32>,
    } else {
    }
    %c0_i32_35 = arith.constant 0 : i32
    %44 = arith.cmpi ne, %arg1, %c0_i32_35 : i32
    %45 = arith.extui %44 : i1 to i32
    %c0_i32_36 = arith.constant 0 : i32
    %46 = arith.cmpi ne, %45, %c0_i32_36 : i32
    scf.if %46 {
      %c0_37 = arith.constant 0 : index
      %c0_38 = arith.constant 0 : index
      %c0_39 = arith.constant 0 : index
      %47 = vector.load %arg11[%c0_37, %c0_38, %c0_39] : memref<1x8x32xf32, #tpu.memory_space<vmem>>, vector<1x8x32xf32>
      %48 = vector.shape_cast %47 : vector<1x8x32xf32> to vector<8x32xf32>
      %49 = arith.addf %48, %40 : vector<8x32xf32>
      %c0_40 = arith.constant 0 : index
      %c0_41 = arith.constant 0 : index
      %c0_42 = arith.constant 0 : index
      %50 = vector.load %arg11[%c0_40, %c0_41, %c0_42] : memref<1x8x32xf32, #tpu.memory_space<vmem>>, vector<1x8x32xf32>
      %51 = vector.shape_cast %50 : vector<1x8x32xf32> to vector<8x32xf32>
      %52 = vector.shape_cast %49 : vector<8x32xf32> to vector<1x8x32xf32>
      tpu.vector_store %arg11[%c0_40, %c0_41, %c0_42], %52 {strides = array<i32>} : memref<1x8x32xf32, #tpu.memory_space<vmem>>, vector<1x8x32xf32>,
    } else {
    }
    return
  }
  func.func @transform_0(%arg0: i32, %arg1: i32) -> (i32, i32, i32) {
    %c0_i32 = arith.constant 0 : i32
    %c0_i32_0 = arith.constant 0 : i32
    %c0_i32_1 = arith.constant 0 : i32
    return %arg0, %c0_i32, %c0_i32_0 : i32, i32, i32
  }
  func.func @transform_1(%arg0: i32, %arg1: i32) -> (i32, i32, i32) {
    %c0_i32 = arith.constant 0 : i32
    %c0_i32_0 = arith.constant 0 : i32
    %c0_i32_1 = arith.constant 0 : i32
    return %arg1, %c0_i32, %c0_i32_0 : i32, i32, i32
  }
  func.func @transform_2(%arg0: i32, %arg1: i32) -> (i32, i32, i32) {
    %c0_i32 = arith.constant 0 : i32
    %c0_i32_0 = arith.constant 0 : i32
    %c0_i32_1 = arith.constant 0 : i32
    return %arg1, %c0_i32, %c0_i32_0 : i32, i32, i32
  }
  func.func @transform_3(%arg0: i32, %arg1: i32) -> (i32, i32, i32) {
    %c0_i32 = arith.constant 0 : i32
    %c0_i32_0 = arith.constant 0 : i32
    %c0_i32_1 = arith.constant 0 : i32
    return %arg1, %c0_i32, %c0_i32_0 : i32, i32, i32
  }
  func.func @transform_4(%arg0: i32, %arg1: i32) -> (i32, i32, i32) {
    %c0_i32 = arith.constant 0 : i32
    %c0_i32_0 = arith.constant 0 : i32
    %c0_i32_1 = arith.constant 0 : i32
    return %arg1, %c0_i32, %c0_i32_0 : i32, i32, i32
  }
  func.func @transform_5(%arg0: i32, %arg1: i32) -> (i32, i32, i32) {
    %c0_i32 = arith.constant 0 : i32
    %c0_i32_0 = arith.constant 0 : i32
    %c0_i32_1 = arith.constant 0 : i32
    return %arg1, %c0_i32, %c0_i32_0 : i32, i32, i32
  }
  func.func @transform_6(%arg0: i32, %arg1: i32) -> (i32, i32, i32) {
    %c0_i32 = arith.constant 0 : i32
    %c0_i32_0 = arith.constant 0 : i32
    %c0_i32_1 = arith.constant 0 : i32
    return %arg1, %c0_i32, %c0_i32_0 : i32, i32, i32
  }
  func.func @transform_7(%arg0: i32, %arg1: i32) -> (i32, i32, i32) {
    %c0_i32 = arith.constant 0 : i32
    %c0_i32_0 = arith.constant 0 : i32
    %c0_i32_1 = arith.constant 0 : i32
    return %arg1, %c0_i32, %c0_i32_0 : i32, i32, i32
  }
  func.func @transform_8(%arg0: i32, %arg1: i32) -> (i32, i32) {
    %c0_i32 = arith.constant 0 : i32
    %c0_i32_0 = arith.constant 0 : i32
    %c0_i32_1 = arith.constant 0 : i32
    return %c0_i32, %c0_i32_0 : i32, i32
  }
  func.func @transform_9(%arg0: i32, %arg1: i32) -> (i32, i32, i32) {
    %c0_i32 = arith.constant 0 : i32
    %c0_i32_0 = arith.constant 0 : i32
    %c0_i32_1 = arith.constant 0 : i32
    return %arg0, %c0_i32, %c0_i32_0 : i32, i32, i32
  }
  func.func @transform_10(%arg0: i32, %arg1: i32) -> (i32, i32, i32, i32) {
    %c0_i32 = arith.constant 0 : i32
    %c0_i32_0 = arith.constant 0 : i32
    %c0_i32_1 = arith.constant 0 : i32
    return %arg0, %arg1, %c0_i32, %c0_i32_0 : i32, i32, i32, i32
  }
}

</mosaic_0001>

<bundles_post_ra>
// kernel: tpu_custom_call.1
= control target key start
LH: loop header
LB: loop body
LE: loop exit
PB: predicated region body
PF: predicated region fallthrough
CT: control target
= control target key end

     0   :  { %s1534_s0 = inlined_call_operand.vmem [shape: f32[2,8,32], index: 0, kind: input, shape index: {}]   ;;  %s1535_s1 = inlined_call_operand.vmem [shape: f32[4,32,8], index: 1, kind: input, shape index: {}]   ;;  %s1536_s2 = inlined_call_operand.vmem [shape: f32[4,32,8], index: 2, kind: input, shape index: {}]   ;;  %s1537_s3 = inlined_call_operand.vmem [shape: f32[4,32,8], index: 3, kind: input, shape index: {}]   ;;  %s1538_s4 = inlined_call_operand.vmem [shape: f32[4,1,8], index: 4, kind: input, shape index: {}]   ;;  %s1539_s5 = inlined_call_operand.vmem [shape: f32[4,1,8], index: 5, kind: input, shape index: {}]   ;;  %s1540_s6 = inlined_call_operand.vmem [shape: f32[4,1,8], index: 6, kind: input, shape index: {}]   ;;  %s1541_s7 = inlined_call_operand.vmem [shape: f32[4,8,32], index: 7, kind: input, shape index: {}]   ;;  %s1542_s8 = inlined_call_operand.vmem [shape: f32[1,32], index: 8, kind: input, shape index: {}]   ;;  %s1543_s9 = inlined_call_operand.hbm [shape: f32[2,8,32], index: 9, kind: output, shape index: {0}]   ;;  %s1544_s10 = inlined_call_operand.hbm [shape: f32[2,4,8,8], index: 10, kind: output, shape index: {1}]  }
   0x1   :  { %1559 = sst [smem:[#allocation18_spill]] %s1534_s0 }
   0x2   :  { %1560 = sst [smem:[#allocation19_spill]] %s1535_s1 }
   0x3   :  { %1561 = sst [smem:[#allocation20_spill]] %s1536_s2 }
   0x4   :  { %1562 = sst [smem:[#allocation21_spill]] %s1537_s3 }
   0x5   :  { %1563 = sst [smem:[#allocation22_spill]] %s1538_s4 }
   0x6   :  { %1564 = sst [smem:[#allocation23_spill]] %s1539_s5 }
   0x7   :  { %1565 = sst [smem:[#allocation24_spill]] %s1540_s6 }
   0x8   :  { %1566 = sst [smem:[#allocation25_spill]] %s1543_s9 }
   0x9   :  { %1567 = sst [smem:[#allocation26_spill]] %s1544_s10 }
   0xa   :  { %16 = vsyncpa [#allocation3], 0 }
   0xb   :  { %18 = vsyncpa [#allocation3 + $0x1], 0 }
   0xc   :  { %19 = vsyncpa [#allocation5], 0 }
   0xd   :  { %21 = vsyncpa [#allocation5 + $0x1], 0  ;;  %s1270_s13 = smov 0   ;;  %s1272_s14 = smov 0  }
   0xe   :  { %s1274_s15 = smov 0   ;;  %s1276_s16 = smov 0  }
   0xf   :  { %s1278_s17 = smov 0   ;;  %s1280_s18 = smov 0  }
  0x10   :  { %s1282_s19 = smov 0   ;;  %s1284_s20 = smov 0  }
  0x11   :  { %s1286_s21 = smov 0   ;;  %s1288_s22 = smov 0  }
  0x12   :  { %s1290_s23 = smov 0  }
  0x13 LB: > { %1568 = sst [smem:[#allocation8_spill]] %s1181_s15  ;;  %s921_s24 = sadd.s32 4294967295, %s1213_s23   ;;  %s1213_s23 = sphi %s1290_s23, %s27_s23   ;;  %s1209_s22 = sphi %s1288_s22, %s1606_s22   ;;  %s1205_s21 = sphi %s1286_s21, %s1605_s21   ;;  %s1201_s20 = sphi %s1284_s20, %s1604_s20   ;;  %s1197_s19 = sphi %s1282_s19, %s1603_s19   ;;  %s1193_s18 = sphi %s1280_s18, %s1602_s18   ;;  %s1189_s17 = sphi %s1278_s17, %s1610_s17   ;;  %s1185_s16 = sphi %s1276_s16, %s1609_s16   ;;  %s1181_s15 = sphi %s1274_s15, %s1600_s15   ;;  %s1177_s14 = sphi %s1272_s14, %s1608_s14   ;;  %s1173_s13 = sphi %s1270_s13, %s1607_s13  }
  0x14   : > { %1569 = sst [smem:[#allocation9_spill]] %s1185_s16  ;;  %s922_s25 = sadd.s32 4294967294, %s1213_s23  }
  0x15   : > { %1570 = sst [smem:[#allocation10_spill]] %s1193_s18  ;;  %s36_s26 = sadd.s32 1, %s1205_s21 }
  0x16   : > { %1571 = sst [smem:[#allocation11_spill]] %s1205_s21  ;;  %s39_s27 = sadd.s32 1, %s1209_s22 }
  0x17   : > { %1572 = sst [smem:[#allocation12_spill]] %s1209_s22  ;;  %p37_p0 = scmp.ge.s32.totalorder %s36_s26, 4 }
  0x18   : > { %s275_s28 = sadd.s32 1, %s1193_s18  ;;  %p285_p1 = scmp.ne.s32.totalorder %s1193_s18, %s1189_s17 }
  0x19   : > { %p1332_p2 = scmp.eq.s32.totalorder %s921_s24, 7  ;;  %s1612_s26 = smov (%p37_p0, %s36_s26), 0 }
  0x1a   : > { %1574 = sst [smem:[#allocation13_spill]] %s1612_s26  ;;  %s1614_s27 = smov (!%p37_p0, %s39_s27), %s1209_s22 }
  0x1b   : > { %p1341_p3 = por %p1332_p2, %p285_p1  ;;  %p291_p4 = scmp.ne.s32.totalorder %s1189_s17, %s1185_s16 }
  0x1c   : > { %p41_p5 = scmp.ge.s32.totalorder %s1614_s27, 2  ;;  %p1347_p6 = scmp.eq.s32.totalorder %s922_s25, 7 }
  0x1d   : > { %s1575_s30 = scalar_select %p1341_p3, 1, 0 }
  0x1e   : > { %s299_s12 = ssub.s32 %s1205_s21, %s1612_s26  ;;  %s303_s24 = sadd.s32 1, %s1181_s15 }
  0x1f   : > { %1576 = sst [smem:[#allocation14_spill]] %s1575_s30  ;;  %s1616_s27 = smov (%p41_p5, %s1614_s27), 0 }
  0x20   : > { %1578 = sst [smem:[#allocation15_spill]] %s1616_s27  ;;  %p1358_p7 = por %p1347_p6, %p291_p4 }
  0x21   : > { %p313_p8 = scmp.ne.s32.totalorder %s1181_s15, %s1177_s14  ;;  %s272_s16 = ssub.s32 %s1209_s22, %s1616_s27 }
  0x22   : > { %p319_p9 = scmp.ne.s32.totalorder %s1177_s14, %s1173_s13  ;;  %p273_p10 = scmp.eq.s32.totalorder %s272_s16, 0 }
  0x23   : > { %s300_s25 = sor.u32 %s299_s12, %s272_s16  ;;  %p1370_p12 = por %p313_p8, %p1332_p2 }
  0x24   : > { %p301_p11 = scmp.eq.s32.totalorder %s300_s25, 0  ;;  %p1382_p13 = por %p319_p9, %p1347_p6 }
  0x25   : > { %s1375_s26 = scalar_select %p273_p10, %s1193_s18, %s275_s28  }
  0x26   : > { %s1378_s21 = scalar_select %p301_p11, %s1181_s15, %s303_s24  }
  0x27   : > { %1581 = sst [smem:[#allocation16_spill]] %s1375_s26  ;;  %p925_p0 = scmp.ge.s32.totalorder %s1213_s23, 1 }
  0x28   : > { %1582 = sst [smem:[#allocation17_spill]] %s1378_s21  ;;  %p397_p1 = scmp.lt.s32.totalorder %s1213_s23, 9 }
  0x2a   : > { %p398_p4 = pnand %p925_p0, %p397_p1 }
  0x2b   : > { %p471_p2 = scmp.lt.s32.totalorder (!%p398_p4), %s1197_s19, 3  ;;  %s1555_s16 = sand.u32 (!%p398_p4), 1, %s1189_s17  }
  0x2c   : > { %401 = sbr.rel (%p398_p4) target bundleno = 903 (0x387), region = 56  ;;  %s1392_s28 = sshll.u32 (!%p398_p4), %s1555_s16, 3 }
  0x2d   : > { %p467_p5 = scmp.lt.s32.totalorder (!%p398_p4), %s1201_s20, 1  ;;  %s1584_s5 = sld [smem:[#allocation23_spill]] (!%p398_p4) }
  0x2e   : > { %s1585_s2 = sld [smem:[#allocation20_spill]] (!%p398_p4)  ;;  %s1557_s18 = sand.u32 (!%p398_p4), 1, %s1177_s14  }
  0x2f   : > { %s1586_s1 = sld [smem:[#allocation19_spill]] (!%p398_p4)  ;;  %p943_p6 = scmp.ne.s32.totalorder (!%p398_p4), %s1197_s19, 0 }
  0x30   : > { %s1587_s0 = sld [smem:[#allocation18_spill]] (!%p398_p4) }
  0x31   : > { %s1396_s29 = scalar_select %p471_p2, %s1197_s19, 3  ;;  %vm508_vm0 = vcmask 261120   ;;  %vm588_vm1 = vcmask 64512  }
  0x32   : > { %s468_s15 = scalar_select %p467_p5, %s1201_s20, 1 }
  0x33   : > { %s1399_s11 = sshll.u32 %s1396_s29, 5  ;;  %s491_s25 = scalar_lea.vmem %s1584_s5, %s1396_s29 }
  0x34   : > { %s480_s26 = scalar_lea.vmem %s1585_s2, %s1399_s11  ;;  %s928_s12 = sshll.u32 %s468_s15, 3  ;;  %v1055_v9 = vld [vmem:[%s491_s25] ss:$0 sm:$0xff] }
  0x35   : > { %s475_s21 = scalar_lea.vmem %s1586_s1, %s1399_s11  ;;  %v535_v0 = vld [vmem:[%s480_s26 + $0x18] sm:$0xff]  ;;  %v534_v1 = vld [vmem:[%s480_s26 + $0x10] sm:$0xff]  ;;  %v533_v4 = vld [vmem:[%s480_s26 + $0x8] sm:$0xff]  ;;  %s1588_s4 = sld [smem:[#allocation22_spill]] }
  0x36   : > { %v503_v2 = vld [vmem:[%s475_s21 + $0x18] sm:$0xff]  ;;  %552 = vmatpush.msra.mxu1 %v535_v0  ;;  %v502_v3 = vld [vmem:[%s475_s21 + $0x10] sm:$0xff]  ;;  %v501_v5 = vld [vmem:[%s475_s21 + $0x8] sm:$0xff]  ;;  %s470_s27 = scalar_lea.vmem %s1587_s0, %s928_s12  ;;  %s1589_s3 = sld [smem:[#allocation21_spill]] }
  0x37   : > { %524 = vmatpush.msra.mxu0 %v503_v2  ;;  %v532_v6 = vld [vmem:[%s480_s26] sm:$0xff]  ;;  %s1590_s6 = sld [smem:[#allocation24_spill]]  ;;  %s935_s12 = sshll.u32 %s1396_s29, 3 }
  0x38   : > { %553 = vmatpush.msra.mxu1 %v534_v1  ;;  %v500_v7 = vld [vmem:[%s475_s21] sm:$0xff]  ;;  %s459_s15 = scalar_lea.vmem [#allocation2], %s1392_s28 }
  0x39   : > { %525 = vmatpush.msra.mxu0 %v502_v3  ;;  %v499_v8 = vld [vmem:[%s470_s27] sm:$0xff]  ;;  %s498_s27 = scalar_lea.vmem %s1541_s7, %s935_s12 }
  0x3a   : > { %554 = vmatpush.msra.mxu1 %v533_v4  ;;  %v663_v29 = vld [vmem:[%s498_s27] sm:$0xff] }
  0x3b   : > { %526 = vmatpush.msra.mxu0 %v501_v5  ;;  %s488_s1 = scalar_lea.vmem %s1588_s4, %s1396_s29 }
  0x3c   : > { %555 = vmatpush.msra.mxu1 %v532_v6  ;;  %v1056_v10 = vld [vmem:[%s488_s1] ss:$0 sm:$0xff]  ;;  %s485_s26 = scalar_lea.vmem %s1589_s3, %s1399_s11 }
  0x3d   : > { %527 = vmatpush.msra.mxu0 %v500_v7  ;;  %937 = vmatmul.msk.f32.vlgmr.msra.gmra.mxu1 %vm508_vm0, %v499_v8  ;;  %v563_v15 = vld [vmem:[%s485_s26 + $0x18] sm:$0xff]  ;;  %v562_v18 = vld [vmem:[%s485_s26 + $0x10] sm:$0xff]  ;;  %v561_v19 = vld [vmem:[%s485_s26 + $0x8] sm:$0xff]  ;;  %s494_s25 = scalar_lea.vmem %s1590_s6, %s1396_s29  ;;  %s1443_s29 = sshll.u32 %s1557_s18, 3 }
  0x3e   : > { %936 = vmatmul.msk.f32.vlgmr.msra.gmra.mxu0 %vm508_vm0, %v499_v8  ;;  %580 = vmatpush.msra.mxu2 %v563_v15  ;;  %v560_v20 = vld [vmem:[%s485_s26] sm:$0xff]  ;;  %s1558_s16 = scalar_lea.vmem [#allocation4], %s1443_s29 }
  0x3f   : > { %v1057_v26 = vld [vmem:[%s494_s25] ss:$0 sm:$0xff]  ;;  %682 = vmatpush.msrb.mxu0 %v663_v29 }
  0x40   : > { %581 = vmatpush.msra.mxu2 %v562_v18 }
  0x42   : > { %582 = vmatpush.msra.mxu2 %v561_v19 }
  0x44   : > { %583 = vmatpush.msra.mxu2 %v560_v20 }
  0x45   : > { %938 = vmatmul.msk.f32.vlgmr.msra.gmra.mxu2 %vm508_vm0, %v499_v8 }
  0xba   : > { %v557_v11 = vpop.f32.mrf.mxu1 }
  0xbb   : > { %v529_v12 = vpop.f32.mrf.mxu0  ;;  %v558_v13 = vadd.f32 %v1055_v9, %v557_v11 }
  0xbc   : > { %v530_v14 = vadd.f32 %v1056_v10, %v529_v12 }
  0xbd   : > { %939 = vmatpush.xpose.msk.msra.mxu3 %vm588_vm1, %v558_v13 }
  0xc0   : > { %940 = vmatmul.msk.f32.vlgmr.msra.gmra.mxu3 %vm588_vm1, %v530_v14 }
  0xc8   : > { %v585_v27 = vpop.f32.mrf.mxu2 }
  0xc9   : > { %v586_v28 = vadd.f32 %v1057_v26, %v585_v27 }
  0xcb   : > { %658 = vmatpush.msrb.mxu3 %v586_v28 }
 0x143   : > { %v612_v16 = vpop.f32.mrf.mxu3 }
 0x144   : > { %v615_v17 = vsel %vm588_vm1, %v612_v16, -inf }
 0x145   : > { %616 = vmax.xlane.f32.xlu0 %v615_v17 }
 0x1b8   : > { %v617_v21 = vpop.xlane.xlu0 %616 }
 0x1b9   : > { %v618_v22 = vsub.f32 %v612_v16, %v617_v21 }
 0x1bb   : > { %v619_v23 = vmul.f32 1.442695, %v618_v22 }
 0x1bd   : > { %1058 = vpow2.f32 %v619_v23 }
 0x1c3   : > { %v1059_v24 = vpop.eup %1058 }
 0x1c4   : > { %v621_v25 = vsel %vm588_vm1, %v1059_v24, 0.0 }
 0x1c5   : > { %622 = vadd.xlane.f32.xlu0 %v621_v25 }
 0x238   : > { %v623_v30 = vpop.xlane.xlu0 %622 }
 0x239   : > { %1060 = vrcp.f32 %v623_v30  ;;  %v635_v34 = vand.u32 2147483648, %v623_v30  ;;  %v633_v36 = vand.u32 2147483647, %v623_v30  ;;  %vm629_vm3 = vweird.f32 %v623_v30 }
 0x23b   : > { %v636_v38 = vor.u32 1.1754944e-38, %v635_v34  ;;  %vm634_vm5 = vcmp.eq.f32.partialorder %v633_v36, 8.507059e+37 }
 0x23f   : > { %v1061_v31 = vpop.eup %1060 }
 0x240   : > { %v625_v32 = vmul.f32 %v1061_v31, %v623_v30  ;;  %vm630_vm2 = vweird.f32 %v1061_v31 }
 0x241   : > { %vm631_vm4 = vmor %vm629_vm3, %vm630_vm2 }
 0x242   : > { %v626_v33 = vsub.f32 1.0, %v625_v32 }
 0x244   : > { %v627_v35 = vmul.f32 %v1061_v31, %v626_v33 }
 0x246   : > { %v628_v37 = vadd.f32 %v1061_v31, %v627_v35 }
 0x248   : > { %v632_v39 = vsel %vm631_vm4, %v1061_v31, %v628_v37 }
 0x249   : > { %v637_v40 = vsel %vm634_vm5, %v636_v38, %v632_v39 }
 0x24a   : > { %v638_v41 = vmul.f32 %v1059_v24, %v637_v40 }
 0x24c   : > { %639 = vst.msk [vmem:[%s1558_s16] sm:$0xff] %vm588_vm1, %v638_v41  ;;  %941 = vmatmul.msk.f32.vlgmr.msrb.gmra.mxu3 %vm588_vm1, %v638_v41 }
 0x2cf   : > { %v660_v42 = vpop.f32.mrf.mxu3 }
 0x2d0   : > { %942 = vmatmul.msk.f32.vlgmr.msrb.gmra.mxu0 %vm588_vm1, %v660_v42 }
 0x349   : > { %690 = sbr.rel (%p943_p6) target bundleno = 850 (0x352), region = 60 }
 0x34d   : > { %v684_v43 = vpop.f32.mrf.mxu0 }
 0x34e   : > { %v1062_v44 = vld [vmem:[%s1542_s8] ss:$0 sm:$0xff] }
 0x34f   : > { %v695_v45 = vadd.f32 %v1062_v44, %v684_v43 }
 0x351   : > { %696 = vst.msk [vmem:[%s459_s15] sm:$0xff] %vm508_vm0, %v695_v45 }
 0x352 PF: > { %p944_p8 = scmp.eq.s32.totalorder %s1197_s19, 0 }
 0x354   : > { %700 = sbr.rel (%p944_p8) target bundleno = 861 (0x35d), region = 64 }
 0x359   : > { %v701_v46 = vld [vmem:[%s459_s15] sm:$0xff] }
 0x35a   : > { %v702_v47 = vadd.f32 %v701_v46, %v684_v43 }
 0x35c   : > { %703 = vst.msk [vmem:[%s459_s15] sm:$0xff] %vm508_vm0, %v702_v47 }
 0x35d PF: > { %s947_s1 = sshll.u32 %s1201_s20, 3  ;;  %s1592_s12 = sld [smem:[#allocation25_spill]] }
 0x35e   : > { %s722_s22 = sshll.u32 %s459_s15, 4  ;;  %s1593_s21 = sand.u32 1, %s1189_s17   ;;  %s723_s22 = int_to_ptr.vmem [resolvable:$true] %s722_s22 }
 0x35f   : > { %s705_s26 = scalar_lea.sflag [#allocation3], %s1593_s21 }
 0x363   : > { %s720_s24 = scalar_lea.hbm %s1592_s12, %s947_s1  ;;  %s1083_s3 = scalar_lea.hbm %s1592_s12, 16 }
 0x364   : > { %s724_s27 = sshll.u32 %s720_s24, 4  ;;  %s725_s27 = int_to_ptr.hbm [resolvable:$true] %s724_s27 }
 0x365   : > { %s1077_s18 = sshra.s32 %s725_s27, 4  ;;  %s1078_s18 = int_to_ptr.hbm [resolvable:$true] %s1077_s18 }
 0x366   : > { %s1079_s16 = scalar_lea.hbm %s1078_s18, 8  ;;  %p1084_p0 = scmp.lt.s32.totalorder %s1078_s18, %s1592_s12 }
 0x367   : > { %p1080_p9 = scmp.ne.s32.totalorder %s1078_s18, %s1079_s16  ;;  %p1085_p1 = scmp.lt.s32.totalorder %s1083_s3, %s1079_s16 }
 0x369   : > { %p1081_p10 = pnand %p1080_p9, %p1341_p3  ;;  %p1086_p4 = por %p1085_p1, %p1084_p0 }
 0x36b   : > { %p1082_p11 = pneg %p1081_p10 }
 0x36d   : > { %p1087_p2 = pnand %p1086_p4, %p1082_p11 }
 0x36f   : > { %1090 = shalt.err (!%p1087_p2)
}
 0x370   : > { %955 = dma.vmem_to_hbm [thread:$0]  (%p1341_p3), %s723_s22, 128, %s725_s27, %s705_s26  }
 0x371   : > { %s948_s15 = sshll.u32 %s1201_s20, 2  ;;  %s1594_s1 = scalar_lea.vmem [#allocation4], %s1443_s29 }
 0x372   : > { %s738_s0 = sshll.u32 %s1594_s1, 4  ;;  %s734_s2 = sadd.s32 %s1197_s19, %s948_s15  ;;  %s739_s0 = int_to_ptr.vmem [resolvable:$true] %s738_s0 }
 0x373   : > { %s949_s25 = sshll.u32 %s734_s2, 3  ;;  %s1595_s18 = sld [smem:[#allocation26_spill]] }
 0x374   : > { %s1597_s21 = sand.u32 1, %s1177_s14  }
 0x375   : > { %s710_s28 = scalar_lea.sflag [#allocation5], %s1597_s21 }
 0x379   : > { %s1596_s11 = smov %s1595_s18  ;;  %s736_s3 = scalar_lea.hbm %s1595_s18, %s949_s25 }
 0x37a   : > { %s740_s16 = sshll.u32 %s736_s3, 4  ;;  %s1111_s19 = scalar_lea.hbm %s1596_s11, 64  ;;  %s741_s16 = int_to_ptr.hbm [resolvable:$true] %s740_s16 }
 0x37b   : > { %s1105_s5 = sshra.s32 %s741_s16, 4  ;;  %s1106_s5 = int_to_ptr.hbm [resolvable:$true] %s1105_s5 }
 0x37c   : > { %s1107_s6 = scalar_lea.hbm %s1106_s5, 8  ;;  %p1112_p8 = scmp.lt.s32.totalorder %s1106_s5, %s1596_s11 }
 0x37d   : > { %p1108_p5 = scmp.ne.s32.totalorder %s1106_s5, %s1107_s6  ;;  %p1113_p9 = scmp.lt.s32.totalorder %s1111_s19, %s1107_s6 }
 0x37f   : > { %p1109_p3 = pnand %p1108_p5, %p1370_p12  ;;  %p1114_p10 = por %p1113_p9, %p1112_p8 }
 0x381   : > { %p1110_p6 = pneg %p1109_p3 }
 0x383   : > { %p1115_p11 = pnand %p1114_p10, %p1110_p6 }
 0x385   : > { %1118 = shalt.err (!%p1115_p11)
}
 0x386   : > { %956 = dma.vmem_to_hbm [thread:$0]  (%p1370_p12), %s739_s0, 128, %s741_s16, %s710_s28  }
 0x387 PF: > { %s1598_s26 = sld [smem:[#allocation9_spill]]  ;;  %p966_p0 = scmp.ge.s32.totalorder %s1213_s23, 2 }
 0x389   : > { %p960_p1 = pnand %p966_p0, %p1358_p7 }
 0x38b   : > { %p961_p4 = pneg %p960_p1 }
 0x38d   : > { %s752_s15 = sand.u32 1, %s1598_s26  }
 0x38e   : > { %s753_s1 = scalar_lea.sflag [#allocation3], %s752_s15 }
 0x38f   : > { %1164 = dma.done.wait (%p961_p4), %s753_s1, 128  }
 0x390   : > { %1166 = vsyncadd (%p961_p4), %s753_s1, 4294967168  ;;  %s762_s5 = sand.u32 1, %s1173_s13   ;;  %p963_p2 = pnand %p966_p0, %p1382_p13 }
 0x391   : > { %s763_s6 = scalar_lea.sflag [#allocation5], %s762_s5 }
 0x392   : > { %p964_p5 = pneg %p963_p2 }
 0x394   : > { %1168 = dma.done.wait (%p964_p5), %s763_s6, 128  }
 0x395   : > { %1170 = vsyncadd (%p964_p5), %s763_s6, 4294967168  ;;  %s27_s23 = sadd.s32 1, %s1213_s23   ;;  %s1599_s9 = sld [smem:[#allocation8_spill]] }
 0x396   : > { %p24_p12 = scmp.ge.s32.totalorder %s27_s23, 10   ;;  %s1600_s15 = sld [smem:[#allocation17_spill]] }
 0x397   : > { %s1601_s10 = sld [smem:[#allocation10_spill]]  ;;  %s1607_s13 = smov %s1177_s14 }
 0x398   : > { %s1602_s18 = sld [smem:[#allocation16_spill]]  ;;  %s1609_s16 = smov %s1189_s17 }
 0x399   : > { %s1603_s19 = sld [smem:[#allocation11_spill]]  ;;  %26 = sbr.rel (!%p24_p12) target bundleno = 19 (0x13), region = 137 }
 0x39a   : > { %s1604_s20 = sld [smem:[#allocation12_spill]] }
 0x39b   : > { %s1605_s21 = sld [smem:[#allocation13_spill]]  ;;  %s1608_s14 = smov %s1599_s9 }
 0x39c   : > { %s1606_s22 = sld [smem:[#allocation15_spill]] }
 0x39d   : > { %s1610_s17 = smov %s1601_s10 }
 0x39e   :  { %769 = vsyncpa [#allocation3], 1 }
 0x39f   :  { %771 = vsyncpa [#allocation3 + $0x1], 1 }
 0x3a0   :  { %772 = vsyncpa [#allocation5], 1 }
 0x3a1   :  { %774 = vsyncpa [#allocation5 + $0x1], 1 }

</bundles_post_ra>
